<compile_context>
chip_gen: v7x
topology: tpu7x:2x2x1
jax: 0.10.0
libtpu: 0.0.40
codegen_flags: <defaults>
</compile_context>

<pallas_src>
import jax
import jax.numpy as jnp
from jax.experimental import pallas as pl
from jax.experimental.pallas import tpu as pltpu


def _round_up(x: int, m: int) -> int:
    return ((x + m - 1) // m) * m


def _vmem_capacity_bytes() -> int:
    try:
        return int(pltpu.get_tpu_info().vmem_capacity_bytes)
    except Exception:
        return 64 * 1024 * 1024  # conservative fallback (v7x per-TC VMEM)


def _pick_batch_block(B, t_out, t_in, dp, act_bytes, out_bytes, attn_bytes,
                      vmem_budget, row_cap=512):
    """Largest Bb dividing B whose per-step VMEM footprint fits the budget, with
    Bb <= B//2 (keep grid >= 2 for v7x's two TensorCores) and Bb*T_out <= row_cap."""
    t_in_lanes = _round_up(t_in, 128)
    t_out_sub = _round_up(t_out, 8)
    t_in_sub = _round_up(t_in, 8)

    def footprint(bb):
        # Double-buffered pipeline blocks (inputs + outputs).
        blocks = 2 * bb * (t_out_sub * dp * act_bytes            # decoder output
                           + t_in_sub * dp * act_bytes           # context
                           + t_out_sub * dp * out_bytes          # attended
                           + t_out_sub * t_in_lanes * attn_bytes)  # attn
        weights = 2 * (2 * dp * dp * act_bytes + dp * 4)         # w_mix, w_out, bias
        # f32 in-kernel intermediates: scores/e/attn + mix + y (conservative).
        interm = bb * t_out_sub * (3 * t_in_lanes + 2 * dp) * 4
        return blocks + weights + interm

    cap = max(1, B // 2) if B >= 2 else 1
    cap = min(cap, max(1, row_cap // max(t_out, 1)))
    best = 1
    for bb in range(1, cap + 1):
        if B % bb == 0 and footprint(bb) <= vmem_budget:
            best = bb
    return best


def _make_attention_kernel(fold_batch: bool):
    def kernel(out_ref, ctx_ref, wmix_ref, wout_ref, b_ref, attended_ref, attn_ref):
        # out_ref:      (Bb, T_out, Dp)   decoder features (compute dtype)
        # ctx_ref:      (Bb, T_in,  Dp)   encoder features (compute dtype)
        # wmix_ref:     (Dp, Dp)          linear_out.weight[:, :D].T (padded)
        # wout_ref:     (Dp, Dp)          linear_out.weight[:, D:].T (padded)
        # b_ref:        (1, Dp)           linear_out.bias (f32, padded)
        # attended_ref: (Bb, T_out, Dp)
        # attn_ref:     (Bb, T_out, T_in)
        q = out_ref[...]                      # (Bb, T_out, Dp)
        c = ctx_ref[...]                      # (Bb, T_in,  Dp)
        bb, t_out, d = q.shape

        # scores = output @ context^T (contract the feature dim directly, f32 acc).
        scores = jnp.einsum("bqd,bkd->bqk", q, c,
                            preferred_element_type=jnp.float32)   # (Bb, T_out, T_in)
        # TODO(synk): optional user-supplied attention mask (set_mask / masked_fill_(-inf))
        # is not wired in; the module default is mask=None.

        m = jnp.max(scores, axis=-1, keepdims=True)
        e = jnp.exp(scores - m)
        denom = jnp.sum(e, axis=-1, keepdims=True)
        attn = e * pl.reciprocal(denom, approx=True)              # softmax via EUP vrcp
        attn_ref[...] = attn.astype(attn_ref.dtype)

        # mix = attn @ context
        mix = jnp.einsum("bqk,bkd->bqd", attn.astype(c.dtype), c,
                         preferred_element_type=jnp.float32)      # (Bb, T_out, Dp) f32

        bias = b_ref[...].astype(jnp.float32)                     # (1, Dp)
        if fold_batch:
            # Batch folded into one (Bb*T_out, Dp) row block (layout-free reshape since
            # T_out is a sublane multiple for the compute dtype).
            q2 = q.reshape(bb * t_out, d)
            mix2 = mix.astype(wmix_ref.dtype).reshape(bb * t_out, d)
            y = (jnp.dot(mix2, wmix_ref[...], preferred_element_type=jnp.float32)
                 + jnp.dot(q2, wout_ref[...], preferred_element_type=jnp.float32)
                 + bias)
            attended_ref[...] = jnp.tanh(y).reshape(bb, t_out, d).astype(attended_ref.dtype)
        else:
            # Batched form: avoids a reshape that would cross (8,128) tile boundaries.
            y = (jnp.einsum("bqd,de->bqe", mix.astype(wmix_ref.dtype), wmix_ref[...],
                            preferred_element_type=jnp.float32)
                 + jnp.einsum("bqd,de->bqe", q, wout_ref[...],
                              preferred_element_type=jnp.float32)
                 + bias)
            attended_ref[...] = jnp.tanh(y).astype(attended_ref.dtype)

    return kernel


def attention_forward(output, context, weight, bias, *,
                      compute_dtype=None, attn_dtype=None, batch_block=None):
    """
    output:  (B, T_out, D)  decoder features
    context: (B, T_in,  D)  encoder features
    weight:  (D, 2*D)       nn.Linear(dim*2, dim).weight
    bias:    (D,)           nn.Linear(dim*2, dim).bias
    compute_dtype: optional MXU operand dtype (e.g. jnp.bfloat16 on v6e/v7x);
                   accumulation stays f32.  None keeps the input dtype.
    attn_dtype:    dtype of the returned attention weights (default: output.dtype,
                   matching the PyTorch module; pass bf16 to halve writeback bytes).
    returns: attended (B, T_out, D) [output.dtype], attn (B, T_out, T_in) [attn_dtype]
    """
    B, T_out, D = output.shape
    Bc, T_in, Dc = context.shape
    assert Bc == B and Dc == D
    out_dtype = jnp.dtype(output.dtype)
    act_dtype = jnp.dtype(compute_dtype) if compute_dtype is not None else out_dtype
    attn_out_dtype = jnp.dtype(attn_dtype) if attn_dtype is not None else out_dtype

    # Pad the feature dim to a lane multiple: MXU operands and the attended store
    # become lane-dense; zero-padded features contribute exactly zero.
    Dp = _round_up(D, 128)
    output_c = output.astype(act_dtype)
    context_c = context.astype(act_dtype)
    # Pre-split / pre-transpose linear_out weight:
    # [mix, out] @ W.T == mix @ W[:, :D].T + out @ W[:, D:].T
    w_mix = weight[:, :D].T.astype(act_dtype)       # (D, D)
    w_out = weight[:, D:].T.astype(act_dtype)       # (D, D)
    b2 = bias.reshape(1, D).astype(jnp.float32)
    if Dp != D:
        pad = Dp - D
        output_c = jnp.pad(output_c, ((0, 0), (0, 0), (0, pad)))
        context_c = jnp.pad(context_c, ((0, 0), (0, 0), (0, pad)))
        w_mix = jnp.pad(w_mix, ((0, pad), (0, pad)))
        w_out = jnp.pad(w_out, ((0, pad), (0, pad)))
        b2 = jnp.pad(b2, ((0, 0), (0, pad)))

    # Chip-aware VMEM budgeting.
    vmem_cap = _vmem_capacity_bytes()
    vmem_limit = min(int(vmem_cap * 0.75), 112 * 1024 * 1024)   # 48 MiB on v7x, 96 MiB on v5e/v6e
    vmem_budget = int(vmem_limit * 0.8)                         # ~60% of physical VMEM

    if batch_block is None:
        Bb = _pick_batch_block(B, T_out, T_in, Dp,
                               act_dtype.itemsize, out_dtype.itemsize,
                               attn_out_dtype.itemsize, vmem_budget)
    else:
        Bb = int(batch_block)
    assert B % Bb == 0, "batch_block must divide the batch size"
    grid = (B // Bb,)
    # TODO(synk): for very long contexts where even Bb=1 overflows the VMEM budget, add a
    # trailing "arbitrary" key-axis grid dim with online-softmax scratch (attn output then
    # needs a two-pass normalize); current design holds the full key axis per step.

    sublane = {4: 8, 2: 16, 1: 32}.get(act_dtype.itemsize, 8)
    fold_batch = (T_out % sublane == 0)
    kernel = _make_attention_kernel(fold_batch)

    out_shape = (jax.ShapeDtypeStruct((B, T_out, Dp), out_dtype),
                 jax.ShapeDtypeStruct((B, T_out, T_in), attn_out_dtype))
    out_specs = [pl.BlockSpec((Bb, T_out, Dp), lambda b: (b, 0, 0)),
                 pl.BlockSpec((Bb, T_out, T_in), lambda b: (b, 0, 0))]

    def _nbytes(a):
        return int(a.size) * a.dtype.itemsize

    bytes_accessed = (_nbytes(output_c) + _nbytes(context_c) + _nbytes(w_mix)
                      + _nbytes(w_out) + _nbytes(b2)
                      + B * T_out * Dp * out_dtype.itemsize
                      + B * T_out * T_in * attn_out_dtype.itemsize)
    flops = 4 * B * T_out * T_in * Dp + 4 * B * T_out * Dp * Dp
    transcendentals = B * T_out * (T_in + Dp + 1)
    cost = pl.CostEstimate(flops=flops, transcendentals=transcendentals,
                           bytes_accessed=bytes_accessed)

    def _run(single_buffer_weights):
        if single_buffer_weights:
            # Grid-invariant weights/bias: single buffer reclaims VMEM at zero perf cost.
            w_spec = pl.BlockSpec((Dp, Dp), lambda b: (0, 0), pipeline_mode=pl.Buffered(1))
            b_spec = pl.BlockSpec((1, Dp), lambda b: (0, 0), pipeline_mode=pl.Buffered(1))
        else:
            w_spec = pl.BlockSpec((Dp, Dp), lambda b: (0, 0))
            b_spec = pl.BlockSpec((1, Dp), lambda b: (0, 0))
        grid_spec = pltpu.PrefetchScalarGridSpec(
            num_scalar_prefetch=0,
            grid=grid,
            in_specs=[
                pl.BlockSpec((Bb, T_out, Dp), lambda b: (b, 0, 0)),
                pl.BlockSpec((Bb, T_in, Dp), lambda b: (b, 0, 0)),
                w_spec, w_spec, b_spec,
            ],
            out_specs=out_specs,
        )
        return pl.pallas_call(
            kernel,
            grid_spec=grid_spec,
            out_shape=out_shape,
            compiler_params=pltpu.CompilerParams(
                dimension_semantics=("parallel",),
                vmem_limit_bytes=vmem_limit,
            ),
            cost_estimate=cost,
        )(output_c, context_c, w_mix, w_out, b2)

    try:
        attended_p, attn = jax.block_until_ready(_run(True))
    except Exception:
        # Installed JAX may not accept pipeline_mode=pl.Buffered(1); fall back.
        attended_p, attn = jax.block_until_ready(_run(False))

    attended = attended_p[:, :, :D] if Dp != D else attended_p
    return attended, attn


def _reference(output, context, weight, bias):
    scores = jnp.einsum("bqd,bkd->bqk", output, context)
    attn = jax.nn.softmax(scores, axis=-1)
    mix = jnp.einsum("bqk,bkd->bqd", attn, context)
    combined = jnp.concatenate([mix, output], axis=-1)
    out = jnp.tanh(combined @ weight.T + bias)
    return out, attn


if __name__ == "__main__":
    # Small shapes consistent with the module: batch=2, output_len=8, input_len=6, dim=32.
    B, T_OUT, T_IN, D = 2, 8, 6, 32

    key = jax.random.PRNGKey(0)
    k1, k2, k3, k4 = jax.random.split(key, 4)
    output = jax.random.normal(k1, (B, T_OUT, D), dtype=jnp.float32)
    context = jax.random.normal(k2, (B, T_IN, D), dtype=jnp.float32)

    # Deterministic Linear(2*D -> D) params, PyTorch-style uniform(-1/sqrt(2D), 1/sqrt(2D)).
    bound = 1.0 / jnp.sqrt(jnp.float32(2 * D))
    weight = jax.random.uniform(k3, (D, 2 * D), minval=-bound, maxval=bound,
                                dtype=jnp.float32)
    bias = jax.random.uniform(k4, (D,), minval=-bound, maxval=bound,
                              dtype=jnp.float32)

    ref_out, ref_attn = _reference(output, context, weight, bias)

    # f32 path (only the approx softmax reciprocal differs from the reference).
    attended, attn = attention_forward(output, context, weight, bias)
    attended, attn = jax.block_until_ready((attended, attn))
    assert attended.shape == (B, T_OUT, D)
    assert attn.shape == (B, T_OUT, T_IN)
    assert attended.dtype == output.dtype
    assert attn.dtype == output.dtype            # module contract: attn in activation dtype
    assert jnp.allclose(attended, ref_out, atol=5e-3, rtol=5e-3)
    assert jnp.allclose(attn, ref_attn, atol=5e-3, rtol=5e-3)

    # bf16 MXU-operand path (v6e/v7x recommendation): f32 accumulation, looser tolerance.
    att_bf, attn_bf = attention_forward(output, context, weight, bias,
                                        compute_dtype=jnp.bfloat16)
    att_bf, attn_bf = jax.block_until_ready((att_bf, attn_bf))
    assert att_bf.dtype == output.dtype          # attended keeps the module's output dtype
    assert jnp.allclose(att_bf.astype(jnp.float32), ref_out, atol=1e-1, rtol=1e-1)
    assert jnp.allclose(attn_bf.astype(jnp.float32), ref_attn, atol=1e-1, rtol=1e-1)

    print("KERNEL_OK")
</pallas_src>

<mosaic_0001>
module attributes {stable_mosaic.version = 11 : i64} {
  func.func @kernel(%arg0: i32, %arg1: memref<1x8x128xf32, #tpu.memory_space<vmem>>, %arg2: memref<1x6x128xf32, #tpu.memory_space<vmem>>, %arg3: memref<128x128xf32, #tpu.memory_space<vmem>>, %arg4: memref<128x128xf32, #tpu.memory_space<vmem>>, %arg5: memref<1x128xf32, #tpu.memory_space<vmem>>, %arg6: memref<1x8x128xf32, #tpu.memory_space<vmem>>, %arg7: memref<1x8x6xf32, #tpu.memory_space<vmem>>) attributes {dimension_semantics = [#tpu.dimension_semantics<parallel>], iteration_bounds = array<i64: 2>, scalar_prefetch = 0 : i64, scratch_operands = 0 : i64, tpu.core_type = #tpu.core_type<tc>, window_params = [{transform_indices = @transform_0, window_bounds = array<i64: 1, 8, 128>}, {transform_indices = @transform_1, window_bounds = array<i64: 1, 6, 128>}, {pipeline_mode = #tpu.pipeline_mode<synchronous>, transform_indices = @transform_2, window_bounds = array<i64: 128, 128>}, {pipeline_mode = #tpu.pipeline_mode<synchronous>, transform_indices = @transform_3, window_bounds = array<i64: 128, 128>}, {pipeline_mode = #tpu.pipeline_mode<synchronous>, transform_indices = @transform_4, window_bounds = array<i64: 1, 128>}, {transform_indices = @transform_5, window_bounds = array<i64: 1, 8, 128>}, {transform_indices = @transform_6, window_bounds = array<i64: 1, 8, 6>}]} {
    %c0 = arith.constant 0 : index
    %c0_0 = arith.constant 0 : index
    %c0_1 = arith.constant 0 : index
    %0 = vector.load %arg1[%c0, %c0_0, %c0_1] : memref<1x8x128xf32, #tpu.memory_space<vmem>>, vector<1x8x128xf32>
    %c0_2 = arith.constant 0 : index
    %c0_3 = arith.constant 0 : index
    %c0_4 = arith.constant 0 : index
    %1 = vector.load %arg2[%c0_2, %c0_3, %c0_4] : memref<1x6x128xf32, #tpu.memory_space<vmem>>, vector<1x6x128xf32>
    "tpu.trace_start"() <{level = 10 : i32, message = "bqd,bkd->bqk"}> : () -> ()
    %cst = arith.constant dense<0.000000e+00> : vector<1x8x6xf32>
    %2 = tpu.matmul %0, %1, %cst {dimension_numbers = #tpu.dot_dimension_numbers<[2], [2], [1], [1], [0, 0, 0, 1, 1, 1], [0], [0]>} : vector<1x8x128xf32>, vector<1x6x128xf32>, vector<1x8x6xf32> -> vector<1x8x6xf32>
    "tpu.trace_stop"() : () -> ()
    %cst_5 = arith.constant dense<0xFF800000> : vector<1x8xf32>
    %3 = vector.multi_reduction <maximumf>, %2, %cst_5 [2] : vector<1x8x6xf32> to vector<1x8xf32>
    %4 = vector.shape_cast %3 : vector<1x8xf32> to vector<1x8x1xf32>
    %5 = vector.broadcast %4 : vector<1x8x1xf32> to vector<1x8x6xf32>
    %6 = arith.subf %2, %5 : vector<1x8x6xf32>
    %7 = math.exp %6 : vector<1x8x6xf32>
    %cst_6 = arith.constant dense<0.000000e+00> : vector<1x8xf32>
    %8 = vector.multi_reduction <add>, %7, %cst_6 [2] : vector<1x8x6xf32> to vector<1x8xf32>
    %9 = vector.shape_cast %8 : vector<1x8xf32> to vector<1x8x1xf32>
    %10 = tpu.reciprocal %9 {approx = true} : vector<1x8x1xf32> -> vector<1x8x1xf32>
    %11 = vector.broadcast %10 : vector<1x8x1xf32> to vector<1x8x6xf32>
    %12 = arith.mulf %7, %11 : vector<1x8x6xf32>
    %c0_7 = arith.constant 0 : index
    %c0_8 = arith.constant 0 : index
    %c0_9 = arith.constant 0 : index
    %13 = vector.load %arg7[%c0_7, %c0_8, %c0_9] : memref<1x8x6xf32, #tpu.memory_space<vmem>>, vector<1x8x6xf32>
    tpu.vector_store %arg7[%c0_7, %c0_8, %c0_9], %12 {strides = array<i32>} : memref<1x8x6xf32, #tpu.memory_space<vmem>>, vector<1x8x6xf32>,
    "tpu.trace_start"() <{level = 10 : i32, message = "bqk,bkd->bqd"}> : () -> ()
    %cst_10 = arith.constant dense<0.000000e+00> : vector<1x8x128xf32>
    %14 = tpu.matmul %12, %1, %cst_10 {dimension_numbers = #tpu.dot_dimension_numbers<[2], [1], [1], [2], [0, 0, 0, 1, 1, 2], [0], [0]>} : vector<1x8x6xf32>, vector<1x6x128xf32>, vector<1x8x128xf32> -> vector<1x8x128xf32>
    "tpu.trace_stop"() : () -> ()
    %c0_11 = arith.constant 0 : index
    %c0_12 = arith.constant 0 : index
    %15 = vector.load %arg5[%c0_11, %c0_12] : memref<1x128xf32, #tpu.memory_space<vmem>>, vector<1x128xf32>
    %16 = vector.shape_cast %0 : vector<1x8x128xf32> to vector<8x128xf32>
    %17 = vector.shape_cast %14 : vector<1x8x128xf32> to vector<8x128xf32>
    %c0_13 = arith.constant 0 : index
    %c0_14 = arith.constant 0 : index
    %18 = vector.load %arg3[%c0_13, %c0_14] : memref<128x128xf32, #tpu.memory_space<vmem>>, vector<128x128xf32>
    %cst_15 = arith.constant dense<0.000000e+00> : vector<8x128xf32>
    %19 = tpu.matmul %17, %18, %cst_15 {dimension_numbers = #tpu.dot_dimension_numbers<[1], [0], [0], [1], [0, 0, 1, 1], [], []>} : vector<8x128xf32>, vector<128x128xf32>, vector<8x128xf32> -> vector<8x128xf32>
    %c0_16 = arith.constant 0 : index
    %c0_17 = arith.constant 0 : index
    %20 = vector.load %arg4[%c0_16, %c0_17] : memref<128x128xf32, #tpu.memory_space<vmem>>, vector<128x128xf32>
    %cst_18 = arith.constant dense<0.000000e+00> : vector<8x128xf32>
    %21 = tpu.matmul %16, %20, %cst_18 {dimension_numbers = #tpu.dot_dimension_numbers<[1], [0], [0], [1], [0, 0, 1, 1], [], []>} : vector<8x128xf32>, vector<128x128xf32>, vector<8x128xf32> -> vector<8x128xf32>
    %22 = arith.addf %19, %21 : vector<8x128xf32>
    %23 = vector.broadcast %15 : vector<1x128xf32> to vector<8x128xf32>
    %24 = arith.addf %22, %23 : vector<8x128xf32>
    %25 = math.tanh %24 : vector<8x128xf32>
    %26 = vector.shape_cast %25 : vector<8x128xf32> to vector<1x8x128xf32>
    %c0_19 = arith.constant 0 : index
    %c0_20 = arith.constant 0 : index
    %c0_21 = arith.constant 0 : index
    %27 = vector.load %arg6[%c0_19, %c0_20, %c0_21] : memref<1x8x128xf32, #tpu.memory_space<vmem>>, vector<1x8x128xf32>
    tpu.vector_store %arg6[%c0_19, %c0_20, %c0_21], %26 {strides = array<i32>} : memref<1x8x128xf32, #tpu.memory_space<vmem>>, vector<1x8x128xf32>,
    return
  }
  func.func @transform_0(%arg0: i32) -> (i32, i32, i32) {
    %c0_i32 = arith.constant 0 : i32
    %c0_i32_0 = arith.constant 0 : i32
    %c0_i32_1 = arith.constant 0 : i32
    return %arg0, %c0_i32, %c0_i32_0 : i32, i32, i32
  }
  func.func @transform_1(%arg0: i32) -> (i32, i32, i32) {
    %c0_i32 = arith.constant 0 : i32
    %c0_i32_0 = arith.constant 0 : i32
    %c0_i32_1 = arith.constant 0 : i32
    return %arg0, %c0_i32, %c0_i32_0 : i32, i32, i32
  }
  func.func @transform_2(%arg0: i32) -> (i32, i32) {
    %c0_i32 = arith.constant 0 : i32
    %c0_i32_0 = arith.constant 0 : i32
    %c0_i32_1 = arith.constant 0 : i32
    return %c0_i32, %c0_i32_0 : i32, i32
  }
  func.func @transform_3(%arg0: i32) -> (i32, i32) {
    %c0_i32 = arith.constant 0 : i32
    %c0_i32_0 = arith.constant 0 : i32
    %c0_i32_1 = arith.constant 0 : i32
    return %c0_i32, %c0_i32_0 : i32, i32
  }
  func.func @transform_4(%arg0: i32) -> (i32, i32) {
    %c0_i32 = arith.constant 0 : i32
    %c0_i32_0 = arith.constant 0 : i32
    %c0_i32_1 = arith.constant 0 : i32
    return %c0_i32, %c0_i32_0 : i32, i32
  }
  func.func @transform_5(%arg0: i32) -> (i32, i32, i32) {
    %c0_i32 = arith.constant 0 : i32
    %c0_i32_0 = arith.constant 0 : i32
    %c0_i32_1 = arith.constant 0 : i32
    return %arg0, %c0_i32, %c0_i32_0 : i32, i32, i32
  }
  func.func @transform_6(%arg0: i32) -> (i32, i32, i32) {
    %c0_i32 = arith.constant 0 : i32
    %c0_i32_0 = arith.constant 0 : i32
    %c0_i32_1 = arith.constant 0 : i32
    return %arg0, %c0_i32, %c0_i32_0 : i32, i32, i32
  }
}

module attributes {stable_mosaic.version = 11 : i64} {
  func.func @kernel(%arg0: i32, %arg1: memref<1x8x128xf32, #tpu.memory_space<vmem>>, %arg2: memref<1x6x128xf32, #tpu.memory_space<vmem>>, %arg3: memref<128x128xf32, #tpu.memory_space<vmem>>, %arg4: memref<128x128xf32, #tpu.memory_space<vmem>>, %arg5: memref<1x128xf32, #tpu.memory_space<vmem>>, %arg6: memref<1x8x128xf32, #tpu.memory_space<vmem>>, %arg7: memref<1x8x6xf32, #tpu.memory_space<vmem>>) attributes {dimension_semantics = [#tpu.dimension_semantics<parallel>], iteration_bounds = array<i64: 2>, scalar_prefetch = 0 : i64, scratch_operands = 0 : i64, tpu.core_type = #tpu.core_type<tc>, window_params = [{transform_indices = @transform_0, window_bounds = array<i64: 1, 8, 128>}, {transform_indices = @transform_1, window_bounds = array<i64: 1, 6, 128>}, {pipeline_mode = #tpu.pipeline_mode<synchronous>, transform_indices = @transform_2, window_bounds = array<i64: 128, 128>}, {pipeline_mode = #tpu.pipeline_mode<synchronous>, transform_indices = @transform_3, window_bounds = array<i64: 128, 128>}, {pipeline_mode = #tpu.pipeline_mode<synchronous>, transform_indices = @transform_4, window_bounds = array<i64: 1, 128>}, {transform_indices = @transform_5, window_bounds = array<i64: 1, 8, 128>}, {transform_indices = @transform_6, window_bounds = array<i64: 1, 8, 6>}]} {
    %c0 = arith.constant 0 : index
    %c0_0 = arith.constant 0 : index
    %c0_1 = arith.constant 0 : index
    %0 = vector.load %arg1[%c0, %c0_0, %c0_1] : memref<1x8x128xf32, #tpu.memory_space<vmem>>, vector<1x8x128xf32>
    %c0_2 = arith.constant 0 : index
    %c0_3 = arith.constant 0 : index
    %c0_4 = arith.constant 0 : index
    %1 = vector.load %arg2[%c0_2, %c0_3, %c0_4] : memref<1x6x128xf32, #tpu.memory_space<vmem>>, vector<1x6x128xf32>
    "tpu.trace_start"() <{level = 10 : i32, message = "bqd,bkd->bqk"}> : () -> ()
    %cst = arith.constant dense<0.000000e+00> : vector<1x8x6xf32>
    %2 = tpu.matmul %0, %1, %cst {dimension_numbers = #tpu.dot_dimension_numbers<[2], [2], [1], [1], [0, 0, 0, 1, 1, 1], [0], [0]>} : vector<1x8x128xf32>, vector<1x6x128xf32>, vector<1x8x6xf32> -> vector<1x8x6xf32>
    "tpu.trace_stop"() : () -> ()
    %cst_5 = arith.constant dense<0xFF800000> : vector<1x8xf32>
    %3 = vector.multi_reduction <maximumf>, %2, %cst_5 [2] : vector<1x8x6xf32> to vector<1x8xf32>
    %4 = vector.shape_cast %3 : vector<1x8xf32> to vector<1x8x1xf32>
    %5 = vector.broadcast %4 : vector<1x8x1xf32> to vector<1x8x6xf32>
    %6 = arith.subf %2, %5 : vector<1x8x6xf32>
    %7 = math.exp %6 : vector<1x8x6xf32>
    %cst_6 = arith.constant dense<0.000000e+00> : vector<1x8xf32>
    %8 = vector.multi_reduction <add>, %7, %cst_6 [2] : vector<1x8x6xf32> to vector<1x8xf32>
    %9 = vector.shape_cast %8 : vector<1x8xf32> to vector<1x8x1xf32>
    %10 = tpu.reciprocal %9 {approx = true} : vector<1x8x1xf32> -> vector<1x8x1xf32>
    %11 = vector.broadcast %10 : vector<1x8x1xf32> to vector<1x8x6xf32>
    %12 = arith.mulf %7, %11 : vector<1x8x6xf32>
    %c0_7 = arith.constant 0 : index
    %c0_8 = arith.constant 0 : index
    %c0_9 = arith.constant 0 : index
    %13 = vector.load %arg7[%c0_7, %c0_8, %c0_9] : memref<1x8x6xf32, #tpu.memory_space<vmem>>, vector<1x8x6xf32>
    tpu.vector_store %arg7[%c0_7, %c0_8, %c0_9], %12 {strides = array<i32>} : memref<1x8x6xf32, #tpu.memory_space<vmem>>, vector<1x8x6xf32>,
    "tpu.trace_start"() <{level = 10 : i32, message = "bqk,bkd->bqd"}> : () -> ()
    %cst_10 = arith.constant dense<0.000000e+00> : vector<1x8x128xf32>
    %14 = tpu.matmul %12, %1, %cst_10 {dimension_numbers = #tpu.dot_dimension_numbers<[2], [1], [1], [2], [0, 0, 0, 1, 1, 2], [0], [0]>} : vector<1x8x6xf32>, vector<1x6x128xf32>, vector<1x8x128xf32> -> vector<1x8x128xf32>
    "tpu.trace_stop"() : () -> ()
    %c0_11 = arith.constant 0 : index
    %c0_12 = arith.constant 0 : index
    %15 = vector.load %arg5[%c0_11, %c0_12] : memref<1x128xf32, #tpu.memory_space<vmem>>, vector<1x128xf32>
    %16 = vector.shape_cast %0 : vector<1x8x128xf32> to vector<8x128xf32>
    %17 = vector.shape_cast %14 : vector<1x8x128xf32> to vector<8x128xf32>
    %c0_13 = arith.constant 0 : index
    %c0_14 = arith.constant 0 : index
    %18 = vector.load %arg3[%c0_13, %c0_14] : memref<128x128xf32, #tpu.memory_space<vmem>>, vector<128x128xf32>
    %cst_15 = arith.constant dense<0.000000e+00> : vector<8x128xf32>
    %19 = tpu.matmul %17, %18, %cst_15 {dimension_numbers = #tpu.dot_dimension_numbers<[1], [0], [0], [1], [0, 0, 1, 1], [], []>} : vector<8x128xf32>, vector<128x128xf32>, vector<8x128xf32> -> vector<8x128xf32>
    %c0_16 = arith.constant 0 : index
    %c0_17 = arith.constant 0 : index
    %20 = vector.load %arg4[%c0_16, %c0_17] : memref<128x128xf32, #tpu.memory_space<vmem>>, vector<128x128xf32>
    %cst_18 = arith.constant dense<0.000000e+00> : vector<8x128xf32>
    %21 = tpu.matmul %16, %20, %cst_18 {dimension_numbers = #tpu.dot_dimension_numbers<[1], [0], [0], [1], [0, 0, 1, 1], [], []>} : vector<8x128xf32>, vector<128x128xf32>, vector<8x128xf32> -> vector<8x128xf32>
    %22 = arith.addf %19, %21 : vector<8x128xf32>
    %23 = vector.broadcast %15 : vector<1x128xf32> to vector<8x128xf32>
    %24 = arith.addf %22, %23 : vector<8x128xf32>
    %25 = math.tanh %24 : vector<8x128xf32>
    %26 = vector.shape_cast %25 : vector<8x128xf32> to vector<1x8x128xf32>
    %c0_19 = arith.constant 0 : index
    %c0_20 = arith.constant 0 : index
    %c0_21 = arith.constant 0 : index
    %27 = vector.load %arg6[%c0_19, %c0_20, %c0_21] : memref<1x8x128xf32, #tpu.memory_space<vmem>>, vector<1x8x128xf32>
    tpu.vector_store %arg6[%c0_19, %c0_20, %c0_21], %26 {strides = array<i32>} : memref<1x8x128xf32, #tpu.memory_space<vmem>>, vector<1x8x128xf32>,
    return
  }
  func.func @transform_0(%arg0: i32) -> (i32, i32, i32) {
    %c0_i32 = arith.constant 0 : i32
    %c0_i32_0 = arith.constant 0 : i32
    %c0_i32_1 = arith.constant 0 : i32
    return %arg0, %c0_i32, %c0_i32_0 : i32, i32, i32
  }
  func.func @transform_1(%arg0: i32) -> (i32, i32, i32) {
    %c0_i32 = arith.constant 0 : i32
    %c0_i32_0 = arith.constant 0 : i32
    %c0_i32_1 = arith.constant 0 : i32
    return %arg0, %c0_i32, %c0_i32_0 : i32, i32, i32
  }
  func.func @transform_2(%arg0: i32) -> (i32, i32) {
    %c0_i32 = arith.constant 0 : i32
    %c0_i32_0 = arith.constant 0 : i32
    %c0_i32_1 = arith.constant 0 : i32
    return %c0_i32, %c0_i32_0 : i32, i32
  }
  func.func @transform_3(%arg0: i32) -> (i32, i32) {
    %c0_i32 = arith.constant 0 : i32
    %c0_i32_0 = arith.constant 0 : i32
    %c0_i32_1 = arith.constant 0 : i32
    return %c0_i32, %c0_i32_0 : i32, i32
  }
  func.func @transform_4(%arg0: i32) -> (i32, i32) {
    %c0_i32 = arith.constant 0 : i32
    %c0_i32_0 = arith.constant 0 : i32
    %c0_i32_1 = arith.constant 0 : i32
    return %c0_i32, %c0_i32_0 : i32, i32
  }
  func.func @transform_5(%arg0: i32) -> (i32, i32, i32) {
    %c0_i32 = arith.constant 0 : i32
    %c0_i32_0 = arith.constant 0 : i32
    %c0_i32_1 = arith.constant 0 : i32
    return %arg0, %c0_i32, %c0_i32_0 : i32, i32, i32
  }
  func.func @transform_6(%arg0: i32) -> (i32, i32, i32) {
    %c0_i32 = arith.constant 0 : i32
    %c0_i32_0 = arith.constant 0 : i32
    %c0_i32_1 = arith.constant 0 : i32
    return %arg0, %c0_i32, %c0_i32_0 : i32, i32, i32
  }
}

</mosaic_0001>

<bundles_post_ra>
// kernel: tpu_custom_call.1
= control target key start
LH: loop header
LB: loop body
LE: loop exit
PB: predicated region body
PF: predicated region fallthrough
CT: control target
= control target key end

     0   :  { %12 = vsyncpa [#allocation3], 0  ;;  %s1434_s0 = inlined_call_operand.vmem [shape: f32[2,8,128], index: 0, kind: input, shape index: {}]   ;;  %s1435_s1 = inlined_call_operand.vmem [shape: f32[2,6,128], index: 1, kind: input, shape index: {}]   ;;  %s1436_s2 = inlined_call_operand.hbm [shape: f32[128,128], index: 2, kind: input, shape index: {}]   ;;  %s1437_s3 = inlined_call_operand.hbm [shape: f32[128,128], index: 3, kind: input, shape index: {}]   ;;  %s1438_s4 = inlined_call_operand.vmem [shape: f32[1,128], index: 4, kind: input, shape index: {}]   ;;  %s1439_s5 = inlined_call_operand.hbm [shape: f32[2,8,128], index: 5, kind: output, shape index: {0}]   ;;  %s1440_s6 = inlined_call_operand.vmem [shape: f32[2,8,6], index: 6, kind: output, shape index: {1}]  }
   0x1   :  { %13 = vsyncpa [#allocation6], 0 }
   0x2   :  { %14 = vsyncpa [#allocation4], 0 }
   0x3   :  { %16 = vsyncpa [#allocation4 + $0x1], 0  ;;  %s1214_s21 = smov 0   ;;  %s1216_s22 = smov 0  }
   0x4   :  { %s1218_s23 = smov 0   ;;  %s1220_s24 = smov 0  }
   0x5 LB: > { %s1235_s25 = sadd.s32 4294967295, %s1169_s24   ;;  %s787_s26 = sadd.s32 4294967294, %s1169_s24   ;;  %s1169_s24 = sphi %s1220_s24, %s1458_s24   ;;  %s1165_s23 = sphi %s1218_s23, %s1457_s23   ;;  %s1161_s22 = sphi %s1216_s22, %s1456_s22   ;;  %s1157_s21 = sphi %s1214_s21, %s1455_s21  }
   0x6   : > { %s1239_s27 = sadd.s32 1, %s1169_s24   ;;  %s144_s28 = sadd.s32 1, %s1165_s23 }
   0x7   : > { %s141_s29 = ssub.s32 %s1169_s24, %s1239_s27  ;;  %p154_p0 = scmp.ne.s32.totalorder %s1165_s23, %s1161_s22 }
   0x8   : > { %p142_p1 = scmp.eq.s32.totalorder %s141_s29, 0  ;;  %p155_p2 = scmp.eq.s32.totalorder %s1235_s25, 1 }
   0x9   : > { %p160_p3 = scmp.ne.s32.totalorder %s1161_s22, %s1157_s21  ;;  %p161_p4 = scmp.eq.s32.totalorder %s787_s26, 1 }
   0xa   : > { %s1250_s30 = scalar_select %p142_p1, %s1165_s23, %s144_s28  }
   0xb   : > { %p1252_p5 = por %p155_p2, %p154_p0  ;;  %p1256_p6 = por %p161_p4, %p160_p3 }
   0xc   : > { %p788_p7 = scmp.ge.s32.totalorder %s1169_s24, 1  ;;  %p194_p8 = scmp.lt.s32.totalorder %s1169_s24, 3 }
   0xd   : > { %s1444_s7 = scalar_select %p1252_p5, 1, 0 }
   0xe   : > { %s1445_s8 = scalar_select %p1256_p6, 1, 0 }
   0xf   : > { %p1441_p9 = scmp.eq.s32.totalorder %s1235_s25, 0  ;;  %p1263_p10 = pnand %p788_p7, %p194_p8 }
  0x10   : > { %s1171_s10 = smov [#allocation2]   ;;  %s1172_s13 = smov [#allocation5]  }
  0x11   : > { %s1446_s9 = scalar_select %p1263_p10, 1, 0 }
  0x12   : > { %s206_s11 = sshll.u32 %s1171_s10, 4  ;;  %p982_p11 = pneg %p1263_p10  ;;  %s207_s11 = int_to_ptr.vmem [resolvable:$true] %s206_s11 }
  0x13   : > { %s219_s14 = sshll.u32 %s1172_s13, 4  ;;  %s1043_s17 = scalar_lea.hbm %s1436_s2, 2048  ;;  %s1275_s14 = int_to_ptr.vmem [resolvable:$true] %s219_s14 }
  0x14   : > { %p1271_p12 = pnand %p1441_p9, %p982_p11  ;;  %p1044_p13 = scmp.ne.s32.totalorder %s1436_s2, %s1043_s17 }
  0x15   : > { %p1050_p3 = scmp.lt.u32.totalorder %s1043_s17, %s1436_s2 }
  0x16   : > { %p1045_p0 = pneg %p1271_p12 }
  0x18   : > { %p1046_p1 = pnand %p1045_p0, %p1044_p13 }
  0x1a   : > { %p1047_p2 = pneg %p1046_p1 }
  0x1c   : > { %p1052_p4 = pnand %p1050_p3, %p1047_p2 }
  0x1e   : > { %1055 = shalt.err (!%p1052_p4)
}
  0x1f   : > { %s1056_s28 = scalar_lea.vmem %s207_s11, 2048  ;;  %p1064_p9 = scmp.lt.s32.totalorder %s207_s11, %s207_s11 }
  0x20   : > { %p1057_p7 = scmp.ne.s32.totalorder %s207_s11, %s1056_s28  ;;  %p1065_p6 = scmp.lt.s32.totalorder %s1056_s28, %s1056_s28 }
  0x22   : > { %p1059_p8 = pnand %p1057_p7, %p1045_p0  ;;  %p1066_p5 = por %p1065_p6, %p1064_p9 }
  0x24   : > { %p1060_p11 = pneg %p1059_p8 }
  0x26   : > { %p1067_p10 = pnand %p1066_p5, %p1060_p11 }
  0x28   : > { %1070 = shalt.err (!%p1067_p10)
}
  0x29   : > { %s1173_s29 = smov 128   ;;  %s1174_s10 = smov 8  }
  0x2a   : > { %985 = dma.hbm_to_vmem [thread:$0]  (!%p1271_p12), %s1436_s2, 2048, %s207_s11, [#allocation3], %s1173_s29, %s1173_s29, %s1174_s10  }
  0x2b   : > { %s1071_s18 = scalar_lea.hbm %s1437_s3, 2048 }
  0x2c   : > { %p1072_p13 = scmp.ne.s32.totalorder %s1437_s3, %s1071_s18  ;;  %p1078_p9 = scmp.lt.u32.totalorder %s1071_s18, %s1437_s3 }
  0x2e   : > { %p1074_p5 = pnand %p1072_p13, %p1045_p0 }
  0x30   : > { %p1075_p6 = pneg %p1074_p5 }
  0x32   : > { %p1080_p10 = pnand %p1078_p9, %p1075_p6 }
  0x34   : > { %1083 = shalt.err (!%p1080_p10)
}
  0x35   : > { %s1084_s11 = scalar_lea.vmem %s1275_s14, 2048  ;;  %p1092_p4 = scmp.lt.s32.totalorder %s1275_s14, %s1275_s14 }
  0x36   : > { %p1085_p1 = scmp.ne.s32.totalorder %s1275_s14, %s1084_s11  ;;  %p1093_p7 = scmp.lt.s32.totalorder %s1084_s11, %s1084_s11 }
  0x38   : > { %p1087_p2 = pnand %p1085_p1, %p1045_p0  ;;  %p1094_p8 = por %p1093_p7, %p1092_p4 }
  0x3a   : > { %p1088_p3 = pneg %p1087_p2 }
  0x3c   : > { %p1095_p11 = pnand %p1094_p8, %p1088_p3 }
  0x3e   : > { %1098 = shalt.err (!%p1095_p11)
}
  0x3f   : > { %988 = dma.hbm_to_vmem [thread:$0]  (!%p1271_p12), %s1437_s3, 2048, %s1275_s14, [#allocation6], %s1173_s29, %s1173_s29, %s1174_s10  }
  0x40   : > { %p1448_p13 = scmp.ne.s32.totalorder %s1446_s9, 0 }
  0x41   : > { %p1449_p5 = scmp.eq.s32.totalorder (!%p1448_p13), %s1235_s25, 0 }
  0x42   : > { %252 = sbr.rel (%p1448_p13) target bundleno = 1067 (0x42b), region = 40 }
  0x49   : > { %1144 = dma.done.wait (%p1449_p5), [#allocation3], 2048   ;;  %p1450_p0 = pmov %p1449_p5 }
  0x4b   : > { %1146 = vsyncadd (%p1450_p0), [#allocation3], 4294965248  ;;  %p1451_p6 = pmov %p1450_p0 }
  0x4c   : > { %p1452_p9 = pmov %p1450_p0 }
  0x4d   : > { %1148 = dma.done.wait (%p1451_p6), [#allocation6], 2048  }
  0x4e   : > { %1150 = vsyncadd (%p1452_p9), [#allocation6], 4294965248  ;;  %p293_p10 = scmp.lt.s32.totalorder %s1235_s25, 1  ;;  %v1175_v0 = vmov 0.0   ;;  %vm1176_vm0 = vmmov 0   ;;  %vm377_vm1 = vcmask 48128  }
  0x4f   : > { %844 = vmatprep.subr.mxu0 %v1175_v0  ;;  %846 = vmatprep.mubr.msk.f32.mxu0 %vm1176_vm0, %v1175_v0  ;;  %vm393_vm2 = vcmask 1045504   ;;  %v1177_v11 = vmov 0.0|0.0   ;;  %v468_v12 = vld [vmem:[#allocation2] sm:$0xff]  ;;  %v469_v13 = vld [vmem:[#allocation2 + $0x8] sm:$0xff]  ;;  %v470_v15 = vld [vmem:[#allocation2 + $0x10] sm:$0xff]  ;;  %s284_s13 = sand.u32 1, %s1161_s22  }
  0x50   : > { %s294_s9 = scalar_select %p293_p10, %s1235_s25, 1  ;;  %849 = vmatprep.subr.mxu1 %v1175_v0  ;;  %851 = vmatprep.mubr.msk.f32.mxu1 %vm1176_vm0, %v1175_v0  ;;  %v949_v14 = vpack.c.bf16 %v469_v13, %v468_v12  ;;  %v471_v16 = vld [vmem:[#allocation2 + $0x18] sm:$0xff]  ;;  %v472_v18 = vld [vmem:[#allocation2 + $0x20] sm:$0xff]  ;;  %v473_v19 = vld [vmem:[#allocation2 + $0x28] sm:$0xff] }
  0x51   : > { %v952_v17 = vpack.c.bf16 %v471_v16, %v470_v15  ;;  %v955_v20 = vpack.c.bf16 %v473_v19, %v472_v18  ;;  %v474_v21 = vld [vmem:[#allocation2 + $0x30] sm:$0xff]  ;;  %v475_v22 = vld [vmem:[#allocation2 + $0x38] sm:$0xff]  ;;  %v476_v24 = vld [vmem:[#allocation2 + $0x40] sm:$0xff]  ;;  %s795_s15 = sshll.u32 %s284_s13, 3  ;;  %s650_s17 = scalar_lea.sflag [#allocation4], %s284_s13 }
  0x52   : > { %s1342_s12 = sshll.u32 %s294_s9, 3  ;;  %v958_v23 = vpack.c.bf16 %v475_v22, %v474_v21  ;;  %v477_v25 = vld [vmem:[#allocation2 + $0x48] sm:$0xff]  ;;  %v478_v27 = vld [vmem:[#allocation2 + $0x50] sm:$0xff]  ;;  %v479_v28 = vld [vmem:[#allocation2 + $0x58] sm:$0xff]  ;;  %s803_s9 = sshll.u32 %s1235_s25, 7 }
  0x53   : > { %s300_s10 = scalar_lea.vmem %s1435_s1, %s1342_s12  ;;  %s296_s18 = scalar_lea.vmem %s1434_s0, %s1342_s12  ;;  %v961_v26 = vpack.c.bf16 %v477_v25, %v476_v24  ;;  %v964_v29 = vpack.c.bf16 %v479_v28, %v478_v27  ;;  %v480_v30 = vld [vmem:[#allocation2 + $0x60] sm:$0xff]  ;;  %v481_v31 = vld [vmem:[#allocation2 + $0x68] sm:$0xff]  ;;  %v482_v33 = vld [vmem:[#allocation2 + $0x70] sm:$0xff] }
  0x54   : > { %v306_v1 = vld [vmem:[%s300_s10] sm:$0x3f]  ;;  %v967_v32 = vpack.c.bf16 %v481_v31, %v480_v30  ;;  %v483_v34 = vld [vmem:[#allocation2 + $0x78] sm:$0xff]  ;;  %v485_v38 = vld [vmem:[#allocation5 + $0x8] sm:$0xff]  ;;  %s304_s26 = scalar_lea.vmem %s1440_s6, %s1342_s12  ;;  %s286_s12 = scalar_lea.vmem [#allocation7], %s795_s15 }
  0x55   : > { %845 = vmatpush3.xpose.msra.mxu0 %v306_v1  ;;  %v1352_v2 = vld [vmem:[%s296_s18] sm:$0xff]  ;;  %850 = vmatpush3.msk.msra.mxu1 %vm393_vm2, %v306_v1  ;;  %v970_v35 = vpack.c.bf16 %v483_v34, %v482_v33  ;;  %v486_v42 = vld [vmem:[#allocation5 + $0x10] sm:$0xff]  ;;  %v487_v43 = vld [vmem:[#allocation5 + $0x18] sm:$0xff]  ;;  %s667_s14 = sshll.u32 %s286_s12, 4  ;;  %s1392_s16 = scalar_lea.hbm %s1439_s5, %s803_s9  ;;  %s1394_s14 = int_to_ptr.vmem [resolvable:$true] %s667_s14 }
  0x56   : > { %924 = vmatprep.subr.bf16.mxu1 %v1177_v11  ;;  %948 = vmatprep.subr.bf16.mxu0 %v1177_v11  ;;  %v484_v37 = vld [vmem:[#allocation5] sm:$0xff]  ;;  %v928_v44 = vpack.c.bf16 %v487_v43, %v486_v42  ;;  %v489_v46 = vld [vmem:[#allocation5 + $0x28] sm:$0xff]  ;;  %v490_v48 = vld [vmem:[#allocation5 + $0x30] sm:$0xff]  ;;  %s1099_s18 = scalar_lea.vmem %s1394_s14, 128  ;;  %p1453_p1 = scmp.ne.s32.totalorder %s1444_s7, 0 }
  0x57   : > { %v925_v40 = vpack.c.bf16 %v485_v38, %v484_v37  ;;  %v488_v45 = vld [vmem:[#allocation5 + $0x20] sm:$0xff]  ;;  %v491_v49 = vld [vmem:[#allocation5 + $0x38] sm:$0xff]  ;;  %v493_v52 = vld [vmem:[#allocation5 + $0x48] sm:$0xff]  ;;  %p1100_p12 = scmp.ne.s32.totalorder %s1394_s14, %s1099_s18  ;;  %s1178_s25 = smov [#allocation7]  }
  0x58   : > { %847 = vmatmul.mubr.f32.vlgmr.msra.gmra.mrb[0].mxu0 %v1352_v2  ;;  %v931_v47 = vpack.c.bf16 %v489_v46, %v488_v45  ;;  %v934_v50 = vpack.c.bf16 %v491_v49, %v490_v48  ;;  %v492_v51 = vld [vmem:[#allocation5 + $0x40] sm:$0xff]  ;;  %v494_v54 = vld [vmem:[#allocation5 + $0x50] sm:$0xff]  ;;  %v495_v55 = vld [vmem:[#allocation5 + $0x58] sm:$0xff]  ;;  %s1103_s19 = sshll.u32 %s1178_s25, 4  ;;  %s1104_s19 = int_to_ptr.vmem [resolvable:$false] %s1103_s19 }
  0x59   : > { %921 = vmatprep.mubr.msk.f32.mxu0 %vm1176_vm0, %v1175_v0  ;;  %950 = vmatpush3.bf16.msra.mxu0 %v949_v14  ;;  %v937_v53 = vpack.c.bf16 %v493_v52, %v492_v51  ;;  %v940_v56 = vpack.c.bf16 %v495_v55, %v494_v54  ;;  %v496_v57 = vld [vmem:[#allocation5 + $0x60] sm:$0xff]  ;;  %v497_v58 = vld [vmem:[#allocation5 + $0x68] sm:$0xff]  ;;  %v498_v60 = vld [vmem:[#allocation5 + $0x70] sm:$0xff]  ;;  %p1101_p2 = pnand %p1100_p12, %p1453_p1  ;;  %s1105_s20 = scalar_lea.vmem %s1104_s19, 256 }
  0x5a   : > { %951 = vmatprep.subr.bf16.mxu0 %v1177_v11  ;;  %v943_v59 = vpack.c.bf16 %v497_v58, %v496_v57  ;;  %v499_v61 = vld [vmem:[#allocation5 + $0x78] sm:$0xff]  ;;  %p1106_p4 = scmp.lt.s32.totalorder %s1394_s14, %s1104_s19  ;;  %p1107_p7 = scmp.lt.s32.totalorder %s1105_s20, %s1099_s18 }
  0x5b   : > { %v946_v62 = vpack.c.bf16 %v499_v61, %v498_v60  ;;  %p1102_p3 = pneg %p1101_p2 }
  0x5c   : > { %p1108_p8 = por %p1107_p7, %p1106_p4 }
  0x5d   : > { %953 = vmatpush3.bf16.msra.mxu0 %v952_v17 }
  0x5e   : > { %954 = vmatprep.subr.bf16.mxu0 %v1177_v11  ;;  %p1109_p11 = pnand %p1108_p8, %p1102_p3 }
  0x61   : > { %956 = vmatpush3.bf16.msra.mxu0 %v955_v20 }
  0x62   : > { %957 = vmatprep.subr.bf16.mxu0 %v1177_v11 }
  0x65   : > { %959 = vmatpush3.bf16.msra.mxu0 %v958_v23 }
  0x66   : > { %960 = vmatprep.subr.bf16.mxu0 %v1177_v11 }
  0x69   : > { %962 = vmatpush3.bf16.msra.mxu0 %v961_v26 }
  0x6a   : > { %963 = vmatprep.subr.bf16.mxu0 %v1177_v11 }
  0x6d   : > { %965 = vmatpush3.bf16.msra.mxu0 %v964_v29 }
  0x6e   : > { %966 = vmatprep.subr.bf16.mxu0 %v1177_v11 }
  0x71   : > { %968 = vmatpush3.bf16.msra.mxu0 %v967_v32 }
  0x72   : > { %969 = vmatprep.subr.bf16.mxu0 %v1177_v11 }
  0x75   : > { %971 = vmatpush3.bf16.msra.mxu0 %v970_v35 }
 0x12b   : > { %v373_v3 = vpop.f32.mrb[0].mxu0 }
 0x12c   : > { %v848_v4 = vpop.f32.mrb[1].mxu0  ;;  %v378_v5 = vsel %vm377_vm1, %v373_v3, -inf }
 0x12d   : > { %379 = vmax.xlane.f32.xlu0 %v378_v5  ;;  %v801_v4 = vld [vmem:[%s1438_s4] ss:$0 sm:$0xff] }
 0x1ba   : > { %v380_v6 = vpop.xlane.xlu0 %379 }
 0x1bb   : > { %v381_v7 = vsub.f32 %v373_v3, %v380_v6 }
 0x1bd   : > { %v382_v8 = vmul.f32 1.442695, %v381_v7 }
 0x1bf   : > { %1037 = vpow2.f32 %v382_v8 }
 0x1c9   : > { %v1038_v9 = vpop.eup %1037 }
 0x1ca   : > { %v384_v10 = vsel %vm377_vm1, %v1038_v9, 0.0 }
 0x1cb   : > { %385 = vadd.xlane.f32.xlu0 %v384_v10 }
 0x258   : > { %v386_v36 = vpop.xlane.xlu0 %385 }
 0x259   : > { %1039 = vrcp.f32 %v386_v36 }
 0x263   : > { %v1040_v39 = vpop.eup %1039 }
 0x264   : > { %v388_v41 = vmul.f32 %v1040_v39, %v1038_v9 }
 0x266   : > { %389 = vst.msk [vmem:[%s304_s26] sm:$0xff] %vm377_vm1, %v388_v41  ;;  %852 = vmatmul.mubr.msk.f32.vlgmr.msra.gmra.mrb[0].mxu1 %vm377_vm1, %v388_v41 }
 0x267   : > { %926 = vmatpush3.bf16.msra.mxu1 %v925_v40  ;;  %886 = vmatprep.mubr.msk.f32.mxu1 %vm1176_vm0, %v1175_v0 }
 0x268   : > { %927 = vmatprep.subr.bf16.mxu1 %v1177_v11 }
 0x26b   : > { %929 = vmatpush3.bf16.msra.mxu1 %v928_v44 }
 0x26c   : > { %930 = vmatprep.subr.bf16.mxu1 %v1177_v11 }
 0x26f   : > { %932 = vmatpush3.bf16.msra.mxu1 %v931_v47 }
 0x270   : > { %933 = vmatprep.subr.bf16.mxu1 %v1177_v11 }
 0x273   : > { %935 = vmatpush3.bf16.msra.mxu1 %v934_v50 }
 0x274   : > { %936 = vmatprep.subr.bf16.mxu1 %v1177_v11 }
 0x277   : > { %938 = vmatpush3.bf16.msra.mxu1 %v937_v53 }
 0x278   : > { %939 = vmatprep.subr.bf16.mxu1 %v1177_v11 }
 0x27b   : > { %941 = vmatpush3.bf16.msra.mxu1 %v940_v56 }
 0x27c   : > { %942 = vmatprep.subr.bf16.mxu1 %v1177_v11 }
 0x27f   : > { %944 = vmatpush3.bf16.msra.mxu1 %v943_v59 }
 0x280   : > { %945 = vmatprep.subr.bf16.mxu1 %v1177_v11 }
 0x283   : > { %947 = vmatpush3.bf16.msra.mxu1 %v946_v62 }
 0x286   : > { %887 = vmatmul.mubr.f32.vlgmr.msra.gmra.mrb[2].mxu1 %v1352_v2 }
 0x339   : > { %v463_v63 = vpop.f32.mrb[0].mxu1 }
 0x33a   : > { %v853_v0 = vpop.f32.mrb[1].mxu1  ;;  %922 = vmatmul.mubr.f32.vlgmr.msra.gmra.mrb[2].mxu0 %v463_v63 }
 0x359   : > { %v566_v1 = vpop.f32.mrb[2].mxu1 }
 0x35a   : > { %v888_v3 = vpop.f32.mrb[3].mxu1 }
 0x40d   : > { %v636_v5 = vpop.f32.mrb[2].mxu0 }
 0x40e   : > { %v637_v6 = vadd.f32 %v636_v5, %v566_v1  ;;  %v923_v7 = vpop.f32.mrb[3].mxu0 }
 0x410   : > { %v646_v8 = vadd.f32 %v801_v4, %v637_v6 }
 0x412   : > { %1041 = vtanh.f32 %v646_v8 }
 0x41c   : > { %v1042_v2 = vpop.eup %1041 }
 0x41d   : > { %648 = vst [vmem:[%s286_s12] sm:$0xff] %v1042_v2 }
 0x41e   : > { %1112 = shalt.err (!%p1109_p11)
}
 0x41f   : > { %s1113_s26 = scalar_lea.hbm %s1392_s16, 128  ;;  %s1117_s13 = scalar_lea.hbm %s1439_s5, 256 }
 0x420   : > { %p1114_p13 = scmp.ne.s32.totalorder %s1392_s16, %s1113_s26  ;;  %p1118_p6 = scmp.lt.u32.totalorder %s1392_s16, %s1439_s5 }
 0x421   : > { %p1119_p9 = scmp.lt.u32.totalorder %s1117_s13, %s1113_s26  ;;  %p1121_p12 = scmp.lt.u32.totalorder %s1113_s26, %s1392_s16 }
 0x422   : > { %p1115_p5 = pnand %p1114_p13, %p1453_p1 }
 0x423   : > { %p1120_p10 = por %p1119_p9, %p1118_p6 }
 0x424   : > { %p1116_p0 = pneg %p1115_p5 }
 0x425   : > { %p1122_p2 = por %p1121_p12, %p1120_p10 }
 0x427   : > { %p1123_p3 = pnand %p1122_p2, %p1116_p0 }
 0x429   : > { %1126 = shalt.err (!%p1123_p3)
}
 0x42a   : > { %980 = dma.vmem_to_hbm [thread:$0]  (%p1453_p1), %s1394_s14, 128, %s1392_s16, %s650_s17  }
 0x42b PF: > { %p997_p4 = scmp.ge.s32.totalorder %s1169_s24, 2  ;;  %s682_s12 = sand.u32 1, %s1157_s21  }
 0x42c   : > { %p1454_p7 = scmp.ne.s32.totalorder %s1445_s8, 0  ;;  %s683_s29 = scalar_lea.sflag [#allocation4], %s682_s12 }
 0x42e   : > { %p990_p8 = pnand %p997_p4, %p1454_p7 }
 0x430   : > { %1152 = dma.done.wait (!%p990_p8), %s683_s29, 128  }
 0x431   : > { %1154 = vsyncadd (!%p990_p8), %s683_s29, 4294967168  ;;  %p19_p11 = scmp.ge.s32.totalorder %s1239_s27, 4   ;;  %s1455_s21 = smov %s1161_s22 }
 0x432   : > { %s1456_s22 = smov %s1165_s23  ;;  %s1457_s23 = smov %s1250_s30 }
 0x433   : > { %s1458_s24 = smov %s1239_s27  ;;  %21 = sbr.rel (!%p19_p11) target bundleno = 5 (0x5), region = 99 }
 0x43a   :  { %695 = vsyncpa [#allocation3], 1 }
 0x43b   :  { %697 = vsyncpa [#allocation3 + $0x1], 1 }
 0x43c   :  { %698 = vsyncpa [#allocation6], 1 }
 0x43d   :  { %699 = vsyncpa [#allocation4], 1 }
 0x43e   :  { %701 = vsyncpa [#allocation4 + $0x1], 1 }

// kernel: tpu_custom_call.1
= control target key start
LH: loop header
LB: loop body
LE: loop exit
PB: predicated region body
PF: predicated region fallthrough
CT: control target
= control target key end

     0   :  { %12 = vsyncpa [#allocation3], 0  ;;  %s1434_s0 = inlined_call_operand.vmem [shape: f32[2,8,128], index: 0, kind: input, shape index: {}]   ;;  %s1435_s1 = inlined_call_operand.vmem [shape: f32[2,6,128], index: 1, kind: input, shape index: {}]   ;;  %s1436_s2 = inlined_call_operand.hbm [shape: f32[128,128], index: 2, kind: input, shape index: {}]   ;;  %s1437_s3 = inlined_call_operand.hbm [shape: f32[128,128], index: 3, kind: input, shape index: {}]   ;;  %s1438_s4 = inlined_call_operand.vmem [shape: f32[1,128], index: 4, kind: input, shape index: {}]   ;;  %s1439_s5 = inlined_call_operand.hbm [shape: f32[2,8,128], index: 5, kind: output, shape index: {0}]   ;;  %s1440_s6 = inlined_call_operand.vmem [shape: f32[2,8,6], index: 6, kind: output, shape index: {1}]  }
   0x1   :  { %13 = vsyncpa [#allocation6], 0 }
   0x2   :  { %14 = vsyncpa [#allocation4], 0 }
   0x3   :  { %16 = vsyncpa [#allocation4 + $0x1], 0  ;;  %s1214_s21 = smov 0   ;;  %s1216_s22 = smov 0  }
   0x4   :  { %s1218_s23 = smov 0   ;;  %s1220_s24 = smov 0  }
   0x5 LB: > { %s1235_s25 = sadd.s32 4294967295, %s1169_s24   ;;  %s787_s26 = sadd.s32 4294967294, %s1169_s24   ;;  %s1169_s24 = sphi %s1220_s24, %s1458_s24   ;;  %s1165_s23 = sphi %s1218_s23, %s1457_s23   ;;  %s1161_s22 = sphi %s1216_s22, %s1456_s22   ;;  %s1157_s21 = sphi %s1214_s21, %s1455_s21  }
   0x6   : > { %s1239_s27 = sadd.s32 1, %s1169_s24   ;;  %s144_s28 = sadd.s32 1, %s1165_s23 }
   0x7   : > { %s141_s29 = ssub.s32 %s1169_s24, %s1239_s27  ;;  %p154_p0 = scmp.ne.s32.totalorder %s1165_s23, %s1161_s22 }
   0x8   : > { %p142_p1 = scmp.eq.s32.totalorder %s141_s29, 0  ;;  %p155_p2 = scmp.eq.s32.totalorder %s1235_s25, 1 }
   0x9   : > { %p160_p3 = scmp.ne.s32.totalorder %s1161_s22, %s1157_s21  ;;  %p161_p4 = scmp.eq.s32.totalorder %s787_s26, 1 }
   0xa   : > { %s1250_s30 = scalar_select %p142_p1, %s1165_s23, %s144_s28  }
   0xb   : > { %p1252_p5 = por %p155_p2, %p154_p0  ;;  %p1256_p6 = por %p161_p4, %p160_p3 }
   0xc   : > { %p788_p7 = scmp.ge.s32.totalorder %s1169_s24, 1  ;;  %p194_p8 = scmp.lt.s32.totalorder %s1169_s24, 3 }
   0xd   : > { %s1444_s7 = scalar_select %p1252_p5, 1, 0 }
   0xe   : > { %s1445_s8 = scalar_select %p1256_p6, 1, 0 }
   0xf   : > { %p1441_p9 = scmp.eq.s32.totalorder %s1235_s25, 0  ;;  %p1263_p10 = pnand %p788_p7, %p194_p8 }
  0x10   : > { %s1171_s10 = smov [#allocation2]   ;;  %s1172_s13 = smov [#allocation5]  }
  0x11   : > { %s1446_s9 = scalar_select %p1263_p10, 1, 0 }
  0x12   : > { %s206_s11 = sshll.u32 %s1171_s10, 4  ;;  %p982_p11 = pneg %p1263_p10  ;;  %s207_s11 = int_to_ptr.vmem [resolvable:$true] %s206_s11 }
  0x13   : > { %s219_s14 = sshll.u32 %s1172_s13, 4  ;;  %s1043_s17 = scalar_lea.hbm %s1436_s2, 2048  ;;  %s1275_s14 = int_to_ptr.vmem [resolvable:$true] %s219_s14 }
  0x14   : > { %p1271_p12 = pnand %p1441_p9, %p982_p11  ;;  %p1044_p13 = scmp.ne.s32.totalorder %s1436_s2, %s1043_s17 }
  0x15   : > { %p1050_p3 = scmp.lt.u32.totalorder %s1043_s17, %s1436_s2 }
  0x16   : > { %p1045_p0 = pneg %p1271_p12 }
  0x18   : > { %p1046_p1 = pnand %p1045_p0, %p1044_p13 }
  0x1a   : > { %p1047_p2 = pneg %p1046_p1 }
  0x1c   : > { %p1052_p4 = pnand %p1050_p3, %p1047_p2 }
  0x1e   : > { %1055 = shalt.err (!%p1052_p4)
}
  0x1f   : > { %s1056_s28 = scalar_lea.vmem %s207_s11, 2048  ;;  %p1064_p9 = scmp.lt.s32.totalorder %s207_s11, %s207_s11 }
  0x20   : > { %p1057_p7 = scmp.ne.s32.totalorder %s207_s11, %s1056_s28  ;;  %p1065_p6 = scmp.lt.s32.totalorder %s1056_s28, %s1056_s28 }
  0x22   : > { %p1059_p8 = pnand %p1057_p7, %p1045_p0  ;;  %p1066_p5 = por %p1065_p6, %p1064_p9 }
  0x24   : > { %p1060_p11 = pneg %p1059_p8 }
  0x26   : > { %p1067_p10 = pnand %p1066_p5, %p1060_p11 }
  0x28   : > { %1070 = shalt.err (!%p1067_p10)
}
  0x29   : > { %s1173_s29 = smov 128   ;;  %s1174_s10 = smov 8  }
  0x2a   : > { %985 = dma.hbm_to_vmem [thread:$0]  (!%p1271_p12), %s1436_s2, 2048, %s207_s11, [#allocation3], %s1173_s29, %s1173_s29, %s1174_s10  }
  0x2b   : > { %s1071_s18 = scalar_lea.hbm %s1437_s3, 2048 }
  0x2c   : > { %p1072_p13 = scmp.ne.s32.totalorder %s1437_s3, %s1071_s18  ;;  %p1078_p9 = scmp.lt.u32.totalorder %s1071_s18, %s1437_s3 }
  0x2e   : > { %p1074_p5 = pnand %p1072_p13, %p1045_p0 }
  0x30   : > { %p1075_p6 = pneg %p1074_p5 }
  0x32   : > { %p1080_p10 = pnand %p1078_p9, %p1075_p6 }
  0x34   : > { %1083 = shalt.err (!%p1080_p10)
}
  0x35   : > { %s1084_s11 = scalar_lea.vmem %s1275_s14, 2048  ;;  %p1092_p4 = scmp.lt.s32.totalorder %s1275_s14, %s1275_s14 }
  0x36   : > { %p1085_p1 = scmp.ne.s32.totalorder %s1275_s14, %s1084_s11  ;;  %p1093_p7 = scmp.lt.s32.totalorder %s1084_s11, %s1084_s11 }
  0x38   : > { %p1087_p2 = pnand %p1085_p1, %p1045_p0  ;;  %p1094_p8 = por %p1093_p7, %p1092_p4 }
  0x3a   : > { %p1088_p3 = pneg %p1087_p2 }
  0x3c   : > { %p1095_p11 = pnand %p1094_p8, %p1088_p3 }
  0x3e   : > { %1098 = shalt.err (!%p1095_p11)
}
  0x3f   : > { %988 = dma.hbm_to_vmem [thread:$0]  (!%p1271_p12), %s1437_s3, 2048, %s1275_s14, [#allocation6], %s1173_s29, %s1173_s29, %s1174_s10  }
  0x40   : > { %p1448_p13 = scmp.ne.s32.totalorder %s1446_s9, 0 }
  0x41   : > { %p1449_p5 = scmp.eq.s32.totalorder (!%p1448_p13), %s1235_s25, 0 }
  0x42   : > { %252 = sbr.rel (%p1448_p13) target bundleno = 1067 (0x42b), region = 40 }
  0x49   : > { %1144 = dma.done.wait (%p1449_p5), [#allocation3], 2048   ;;  %p1450_p0 = pmov %p1449_p5 }
  0x4b   : > { %1146 = vsyncadd (%p1450_p0), [#allocation3], 4294965248  ;;  %p1451_p6 = pmov %p1450_p0 }
  0x4c   : > { %p1452_p9 = pmov %p1450_p0 }
  0x4d   : > { %1148 = dma.done.wait (%p1451_p6), [#allocation6], 2048  }
  0x4e   : > { %1150 = vsyncadd (%p1452_p9), [#allocation6], 4294965248  ;;  %p293_p10 = scmp.lt.s32.totalorder %s1235_s25, 1  ;;  %v1175_v0 = vmov 0.0   ;;  %vm1176_vm0 = vmmov 0   ;;  %vm377_vm1 = vcmask 48128  }
  0x4f   : > { %844 = vmatprep.subr.mxu0 %v1175_v0  ;;  %846 = vmatprep.mubr.msk.f32.mxu0 %vm1176_vm0, %v1175_v0  ;;  %vm393_vm2 = vcmask 1045504   ;;  %v1177_v11 = vmov 0.0|0.0   ;;  %v468_v12 = vld [vmem:[#allocation2] sm:$0xff]  ;;  %v469_v13 = vld [vmem:[#allocation2 + $0x8] sm:$0xff]  ;;  %v470_v15 = vld [vmem:[#allocation2 + $0x10] sm:$0xff]  ;;  %s284_s13 = sand.u32 1, %s1161_s22  }
  0x50   : > { %s294_s9 = scalar_select %p293_p10, %s1235_s25, 1  ;;  %849 = vmatprep.subr.mxu1 %v1175_v0  ;;  %851 = vmatprep.mubr.msk.f32.mxu1 %vm1176_vm0, %v1175_v0  ;;  %v949_v14 = vpack.c.bf16 %v469_v13, %v468_v12  ;;  %v471_v16 = vld [vmem:[#allocation2 + $0x18] sm:$0xff]  ;;  %v472_v18 = vld [vmem:[#allocation2 + $0x20] sm:$0xff]  ;;  %v473_v19 = vld [vmem:[#allocation2 + $0x28] sm:$0xff] }
  0x51   : > { %v952_v17 = vpack.c.bf16 %v471_v16, %v470_v15  ;;  %v955_v20 = vpack.c.bf16 %v473_v19, %v472_v18  ;;  %v474_v21 = vld [vmem:[#allocation2 + $0x30] sm:$0xff]  ;;  %v475_v22 = vld [vmem:[#allocation2 + $0x38] sm:$0xff]  ;;  %v476_v24 = vld [vmem:[#allocation2 + $0x40] sm:$0xff]  ;;  %s795_s15 = sshll.u32 %s284_s13, 3  ;;  %s650_s17 = scalar_lea.sflag [#allocation4], %s284_s13 }
  0x52   : > { %s1342_s12 = sshll.u32 %s294_s9, 3  ;;  %v958_v23 = vpack.c.bf16 %v475_v22, %v474_v21  ;;  %v477_v25 = vld [vmem:[#allocation2 + $0x48] sm:$0xff]  ;;  %v478_v27 = vld [vmem:[#allocation2 + $0x50] sm:$0xff]  ;;  %v479_v28 = vld [vmem:[#allocation2 + $0x58] sm:$0xff]  ;;  %s803_s9 = sshll.u32 %s1235_s25, 7 }
  0x53   : > { %s300_s10 = scalar_lea.vmem %s1435_s1, %s1342_s12  ;;  %s296_s18 = scalar_lea.vmem %s1434_s0, %s1342_s12  ;;  %v961_v26 = vpack.c.bf16 %v477_v25, %v476_v24  ;;  %v964_v29 = vpack.c.bf16 %v479_v28, %v478_v27  ;;  %v480_v30 = vld [vmem:[#allocation2 + $0x60] sm:$0xff]  ;;  %v481_v31 = vld [vmem:[#allocation2 + $0x68] sm:$0xff]  ;;  %v482_v33 = vld [vmem:[#allocation2 + $0x70] sm:$0xff] }
  0x54   : > { %v306_v1 = vld [vmem:[%s300_s10] sm:$0x3f]  ;;  %v967_v32 = vpack.c.bf16 %v481_v31, %v480_v30  ;;  %v483_v34 = vld [vmem:[#allocation2 + $0x78] sm:$0xff]  ;;  %v485_v38 = vld [vmem:[#allocation5 + $0x8] sm:$0xff]  ;;  %s304_s26 = scalar_lea.vmem %s1440_s6, %s1342_s12  ;;  %s286_s12 = scalar_lea.vmem [#allocation7], %s795_s15 }
  0x55   : > { %845 = vmatpush3.xpose.msra.mxu0 %v306_v1  ;;  %v1352_v2 = vld [vmem:[%s296_s18] sm:$0xff]  ;;  %850 = vmatpush3.msk.msra.mxu1 %vm393_vm2, %v306_v1  ;;  %v970_v35 = vpack.c.bf16 %v483_v34, %v482_v33  ;;  %v486_v42 = vld [vmem:[#allocation5 + $0x10] sm:$0xff]  ;;  %v487_v43 = vld [vmem:[#allocation5 + $0x18] sm:$0xff]  ;;  %s667_s14 = sshll.u32 %s286_s12, 4  ;;  %s1392_s16 = scalar_lea.hbm %s1439_s5, %s803_s9  ;;  %s1394_s14 = int_to_ptr.vmem [resolvable:$true] %s667_s14 }
  0x56   : > { %924 = vmatprep.subr.bf16.mxu1 %v1177_v11  ;;  %948 = vmatprep.subr.bf16.mxu0 %v1177_v11  ;;  %v484_v37 = vld [vmem:[#allocation5] sm:$0xff]  ;;  %v928_v44 = vpack.c.bf16 %v487_v43, %v486_v42  ;;  %v489_v46 = vld [vmem:[#allocation5 + $0x28] sm:$0xff]  ;;  %v490_v48 = vld [vmem:[#allocation5 + $0x30] sm:$0xff]  ;;  %s1099_s18 = scalar_lea.vmem %s1394_s14, 128  ;;  %p1453_p1 = scmp.ne.s32.totalorder %s1444_s7, 0 }
  0x57   : > { %v925_v40 = vpack.c.bf16 %v485_v38, %v484_v37  ;;  %v488_v45 = vld [vmem:[#allocation5 + $0x20] sm:$0xff]  ;;  %v491_v49 = vld [vmem:[#allocation5 + $0x38] sm:$0xff]  ;;  %v493_v52 = vld [vmem:[#allocation5 + $0x48] sm:$0xff]  ;;  %p1100_p12 = scmp.ne.s32.totalorder %s1394_s14, %s1099_s18  ;;  %s1178_s25 = smov [#allocation7]  }
  0x58   : > { %847 = vmatmul.mubr.f32.vlgmr.msra.gmra.mrb[0].mxu0 %v1352_v2  ;;  %v931_v47 = vpack.c.bf16 %v489_v46, %v488_v45  ;;  %v934_v50 = vpack.c.bf16 %v491_v49, %v490_v48  ;;  %v492_v51 = vld [vmem:[#allocation5 + $0x40] sm:$0xff]  ;;  %v494_v54 = vld [vmem:[#allocation5 + $0x50] sm:$0xff]  ;;  %v495_v55 = vld [vmem:[#allocation5 + $0x58] sm:$0xff]  ;;  %s1103_s19 = sshll.u32 %s1178_s25, 4  ;;  %s1104_s19 = int_to_ptr.vmem [resolvable:$false] %s1103_s19 }
  0x59   : > { %921 = vmatprep.mubr.msk.f32.mxu0 %vm1176_vm0, %v1175_v0  ;;  %950 = vmatpush3.bf16.msra.mxu0 %v949_v14  ;;  %v937_v53 = vpack.c.bf16 %v493_v52, %v492_v51  ;;  %v940_v56 = vpack.c.bf16 %v495_v55, %v494_v54  ;;  %v496_v57 = vld [vmem:[#allocation5 + $0x60] sm:$0xff]  ;;  %v497_v58 = vld [vmem:[#allocation5 + $0x68] sm:$0xff]  ;;  %v498_v60 = vld [vmem:[#allocation5 + $0x70] sm:$0xff]  ;;  %p1101_p2 = pnand %p1100_p12, %p1453_p1  ;;  %s1105_s20 = scalar_lea.vmem %s1104_s19, 256 }
  0x5a   : > { %951 = vmatprep.subr.bf16.mxu0 %v1177_v11  ;;  %v943_v59 = vpack.c.bf16 %v497_v58, %v496_v57  ;;  %v499_v61 = vld [vmem:[#allocation5 + $0x78] sm:$0xff]  ;;  %p1106_p4 = scmp.lt.s32.totalorder %s1394_s14, %s1104_s19  ;;  %p1107_p7 = scmp.lt.s32.totalorder %s1105_s20, %s1099_s18 }
  0x5b   : > { %v946_v62 = vpack.c.bf16 %v499_v61, %v498_v60  ;;  %p1102_p3 = pneg %p1101_p2 }
  0x5c   : > { %p1108_p8 = por %p1107_p7, %p1106_p4 }
  0x5d   : > { %953 = vmatpush3.bf16.msra.mxu0 %v952_v17 }
  0x5e   : > { %954 = vmatprep.subr.bf16.mxu0 %v1177_v11  ;;  %p1109_p11 = pnand %p1108_p8, %p1102_p3 }
  0x61   : > { %956 = vmatpush3.bf16.msra.mxu0 %v955_v20 }
  0x62   : > { %957 = vmatprep.subr.bf16.mxu0 %v1177_v11 }
  0x65   : > { %959 = vmatpush3.bf16.msra.mxu0 %v958_v23 }
  0x66   : > { %960 = vmatprep.subr.bf16.mxu0 %v1177_v11 }
  0x69   : > { %962 = vmatpush3.bf16.msra.mxu0 %v961_v26 }
  0x6a   : > { %963 = vmatprep.subr.bf16.mxu0 %v1177_v11 }
  0x6d   : > { %965 = vmatpush3.bf16.msra.mxu0 %v964_v29 }
  0x6e   : > { %966 = vmatprep.subr.bf16.mxu0 %v1177_v11 }
  0x71   : > { %968 = vmatpush3.bf16.msra.mxu0 %v967_v32 }
  0x72   : > { %969 = vmatprep.subr.bf16.mxu0 %v1177_v11 }
  0x75   : > { %971 = vmatpush3.bf16.msra.mxu0 %v970_v35 }
 0x12b   : > { %v373_v3 = vpop.f32.mrb[0].mxu0 }
 0x12c   : > { %v848_v4 = vpop.f32.mrb[1].mxu0  ;;  %v378_v5 = vsel %vm377_vm1, %v373_v3, -inf }
 0x12d   : > { %379 = vmax.xlane.f32.xlu0 %v378_v5  ;;  %v801_v4 = vld [vmem:[%s1438_s4] ss:$0 sm:$0xff] }
 0x1ba   : > { %v380_v6 = vpop.xlane.xlu0 %379 }
 0x1bb   : > { %v381_v7 = vsub.f32 %v373_v3, %v380_v6 }
 0x1bd   : > { %v382_v8 = vmul.f32 1.442695, %v381_v7 }
 0x1bf   : > { %1037 = vpow2.f32 %v382_v8 }
 0x1c9   : > { %v1038_v9 = vpop.eup %1037 }
 0x1ca   : > { %v384_v10 = vsel %vm377_vm1, %v1038_v9, 0.0 }
 0x1cb   : > { %385 = vadd.xlane.f32.xlu0 %v384_v10 }
 0x258   : > { %v386_v36 = vpop.xlane.xlu0 %385 }
 0x259   : > { %1039 = vrcp.f32 %v386_v36 }
 0x263   : > { %v1040_v39 = vpop.eup %1039 }
 0x264   : > { %v388_v41 = vmul.f32 %v1040_v39, %v1038_v9 }
 0x266   : > { %389 = vst.msk [vmem:[%s304_s26] sm:$0xff] %vm377_vm1, %v388_v41  ;;  %852 = vmatmul.mubr.msk.f32.vlgmr.msra.gmra.mrb[0].mxu1 %vm377_vm1, %v388_v41 }
 0x267   : > { %926 = vmatpush3.bf16.msra.mxu1 %v925_v40  ;;  %886 = vmatprep.mubr.msk.f32.mxu1 %vm1176_vm0, %v1175_v0 }
 0x268   : > { %927 = vmatprep.subr.bf16.mxu1 %v1177_v11 }
 0x26b   : > { %929 = vmatpush3.bf16.msra.mxu1 %v928_v44 }
 0x26c   : > { %930 = vmatprep.subr.bf16.mxu1 %v1177_v11 }
 0x26f   : > { %932 = vmatpush3.bf16.msra.mxu1 %v931_v47 }
 0x270   : > { %933 = vmatprep.subr.bf16.mxu1 %v1177_v11 }
 0x273   : > { %935 = vmatpush3.bf16.msra.mxu1 %v934_v50 }
 0x274   : > { %936 = vmatprep.subr.bf16.mxu1 %v1177_v11 }
 0x277   : > { %938 = vmatpush3.bf16.msra.mxu1 %v937_v53 }
 0x278   : > { %939 = vmatprep.subr.bf16.mxu1 %v1177_v11 }
 0x27b   : > { %941 = vmatpush3.bf16.msra.mxu1 %v940_v56 }
 0x27c   : > { %942 = vmatprep.subr.bf16.mxu1 %v1177_v11 }
 0x27f   : > { %944 = vmatpush3.bf16.msra.mxu1 %v943_v59 }
 0x280   : > { %945 = vmatprep.subr.bf16.mxu1 %v1177_v11 }
 0x283   : > { %947 = vmatpush3.bf16.msra.mxu1 %v946_v62 }
 0x286   : > { %887 = vmatmul.mubr.f32.vlgmr.msra.gmra.mrb[2].mxu1 %v1352_v2 }
 0x339   : > { %v463_v63 = vpop.f32.mrb[0].mxu1 }
 0x33a   : > { %v853_v0 = vpop.f32.mrb[1].mxu1  ;;  %922 = vmatmul.mubr.f32.vlgmr.msra.gmra.mrb[2].mxu0 %v463_v63 }
 0x359   : > { %v566_v1 = vpop.f32.mrb[2].mxu1 }
 0x35a   : > { %v888_v3 = vpop.f32.mrb[3].mxu1 }
 0x40d   : > { %v636_v5 = vpop.f32.mrb[2].mxu0 }
 0x40e   : > { %v637_v6 = vadd.f32 %v636_v5, %v566_v1  ;;  %v923_v7 = vpop.f32.mrb[3].mxu0 }
 0x410   : > { %v646_v8 = vadd.f32 %v801_v4, %v637_v6 }
 0x412   : > { %1041 = vtanh.f32 %v646_v8 }
 0x41c   : > { %v1042_v2 = vpop.eup %1041 }
 0x41d   : > { %648 = vst [vmem:[%s286_s12] sm:$0xff] %v1042_v2 }
 0x41e   : > { %1112 = shalt.err (!%p1109_p11)
}
 0x41f   : > { %s1113_s26 = scalar_lea.hbm %s1392_s16, 128  ;;  %s1117_s13 = scalar_lea.hbm %s1439_s5, 256 }
 0x420   : > { %p1114_p13 = scmp.ne.s32.totalorder %s1392_s16, %s1113_s26  ;;  %p1118_p6 = scmp.lt.u32.totalorder %s1392_s16, %s1439_s5 }
 0x421   : > { %p1119_p9 = scmp.lt.u32.totalorder %s1117_s13, %s1113_s26  ;;  %p1121_p12 = scmp.lt.u32.totalorder %s1113_s26, %s1392_s16 }
 0x422   : > { %p1115_p5 = pnand %p1114_p13, %p1453_p1 }
 0x423   : > { %p1120_p10 = por %p1119_p9, %p1118_p6 }
 0x424   : > { %p1116_p0 = pneg %p1115_p5 }
 0x425   : > { %p1122_p2 = por %p1121_p12, %p1120_p10 }
 0x427   : > { %p1123_p3 = pnand %p1122_p2, %p1116_p0 }
 0x429   : > { %1126 = shalt.err (!%p1123_p3)
}
 0x42a   : > { %980 = dma.vmem_to_hbm [thread:$0]  (%p1453_p1), %s1394_s14, 128, %s1392_s16, %s650_s17  }
 0x42b PF: > { %p997_p4 = scmp.ge.s32.totalorder %s1169_s24, 2  ;;  %s682_s12 = sand.u32 1, %s1157_s21  }
 0x42c   : > { %p1454_p7 = scmp.ne.s32.totalorder %s1445_s8, 0  ;;  %s683_s29 = scalar_lea.sflag [#allocation4], %s682_s12 }
 0x42e   : > { %p990_p8 = pnand %p997_p4, %p1454_p7 }
 0x430   : > { %1152 = dma.done.wait (!%p990_p8), %s683_s29, 128  }
 0x431   : > { %1154 = vsyncadd (!%p990_p8), %s683_s29, 4294967168  ;;  %p19_p11 = scmp.ge.s32.totalorder %s1239_s27, 4   ;;  %s1455_s21 = smov %s1161_s22 }
 0x432   : > { %s1456_s22 = smov %s1165_s23  ;;  %s1457_s23 = smov %s1250_s30 }
 0x433   : > { %s1458_s24 = smov %s1239_s27  ;;  %21 = sbr.rel (!%p19_p11) target bundleno = 5 (0x5), region = 99 }
 0x43a   :  { %695 = vsyncpa [#allocation3], 1 }
 0x43b   :  { %697 = vsyncpa [#allocation3 + $0x1], 1 }
 0x43c   :  { %698 = vsyncpa [#allocation6], 1 }
 0x43d   :  { %699 = vsyncpa [#allocation4], 1 }
 0x43e   :  { %701 = vsyncpa [#allocation4 + $0x1], 1 }

</bundles_post_ra>
